<compile_context>
chip_gen: v7x
topology: tpu7x:2x2x1
jax: 0.10.0
libtpu: 0.0.40
codegen_flags: <defaults>
</compile_context>

<pallas_src>
import functools

import jax
import jax.numpy as jnp
import numpy as np
from jax.experimental import pallas as pl
from jax.experimental.pallas import tpu as pltpu


def _pair(t):
    return t if isinstance(t, tuple) else (t, t)


def _round_up(v, m):
    return (v + m - 1) // m * m


def _vmem_cap_bytes():
    """Generation-aware VMEM cap: physical capacity minus headroom for Mosaic scratch."""
    phys = 64 << 20  # conservative fallback (v7x physical)
    try:
        info = pltpu.get_tpu_info()
        phys = int(getattr(info, "vmem_capacity_bytes", phys)) or phys
    except Exception:
        pass
    # v5e/v6e (128 MiB) -> 112 MiB; v7x (64 MiB) -> 48 MiB.
    return max(phys - (16 << 20), (phys * 3) // 4)


def _window_partition_kernel(row_ref, halo_ref, out_ref, *,
                             kH, kW, sH, sW, nH, nW, nH2, nW2, C, full_tile):
    # row_ref:  (kH, nW, kW*C)   window-row `wi` of the image (kH image rows, lane-dense)
    # halo_ref: (sH, nW, kW*C)   first sH image rows of window-row wi+1 (clamped at edge)
    # out_ref:  (n_total, feat)  per-batch output, resident in VMEM across the wi axis
    wi = pl.program_id(1)
    kWC = kW * C
    sWC = sW * C

    # ---- Phase 1: regular windows of this window-row --------------------------------
    win0 = pl.multiple_of(wi * nW, nW)
    if full_tile:
        # Assemble the full (nW, kH*kW*C) slab in registers -> ONE lane-dense store.
        tile = jnp.concatenate([row_ref[i] for i in range(kH)], axis=-1)
        out_ref[pl.ds(win0, nW), :] = tile
    else:
        # kW*C is 128-aligned: per-segment stores are already unmasked & wide.
        for i in range(kH):
            out_ref[pl.ds(win0, nW), pl.ds(i * kWC, kWC)] = row_ref[i]

    # ---- Phase 2: shifted windows (centre crop by (sH, sW)) -------------------------
    if nH2 > 0 and nW2 > 0:
        @pl.when(wi < nH2)
        def _():
            swin0 = nH * nW + wi * nW2

            def shifted_row(i):
                # Source image row sH + wi*kH + i: first (kH - sH) come from row_ref,
                # the last sH come from the halo (head of window-row wi + 1).
                if i < kH - sH:
                    r = row_ref[sH + i]
                else:
                    r = halo_ref[i - (kH - sH)]
                # Shifted window w = tail of segment w ++ head of segment w+1.
                return jnp.concatenate([r[0:nW2, sWC:], r[1:nW2 + 1, 0:sWC]], axis=-1)

            if full_tile:
                tile2 = jnp.concatenate([shifted_row(i) for i in range(kH)], axis=-1)
                out_ref[pl.ds(swin0, nW2), :] = tile2
            else:
                for i in range(kH):
                    out_ref[pl.ds(swin0, nW2), pl.ds(i * kWC, kWC)] = shifted_row(i)


@functools.partial(jax.jit, static_argnames=("window_size", "channels_last"))
def window_partition(x, window_size, *, channels_last=False):
    """Pallas equivalent of Window_partition.forward.

    x: (B, C, H, W) by default (PyTorch layout).  Pass channels_last=True with a
    (B, H, W, C) input to skip the NCHW->NHWC relayout pass entirely.

    Divergences from PyTorch (documented): non-divisible H/W raises instead of silently
    truncating like unfold; window_size components must be >= 2 (shift of 0 makes the
    x[..., sH:-sH, sW:-sW] crop degenerate).
    """
    kH, kW = _pair(window_size)
    if kH < 2 or kW < 2:
        raise ValueError("window_size components must be >= 2.")
    sH, sW = kH // 2, kW // 2

    if channels_last:
        xh = x                                   # (B, H, W, C)
        B, H, W, C = x.shape
    else:
        B, C, H, W = x.shape
        # Glue: PyTorch NCHW -> channel-minor.  One XLA transpose pass over HBM.
        xh = jnp.transpose(x, (0, 2, 3, 1))      # (B, H, W, C)

    if H % kH or W % kW:
        # TODO(synk): ragged H/W support (PyTorch unfold silently drops remainders).
        raise ValueError("H and W must be multiples of the window size.")

    nH, nW = H // kH, W // kW
    nH2, nW2 = (H - 2 * sH) // kH, (W - 2 * sW) // kW
    n_total = nH * nW + nH2 * nW2
    kWC = kW * C
    feat = kH * kWC
    itemsize = jnp.dtype(x.dtype).itemsize

    # Lane-dense view, window-row major: (B, nH, kH, nW, kW*C).  Pure reshape of NHWC.
    x5 = xh.reshape(B, nH, kH, nW, kWC)

    # Assemble full-feature slabs only when the per-segment stores would be lane-masked
    # (kW*C not 128-aligned) and the slab fits comfortably in the vreg file.
    full_tile = (kWC % 128 != 0) and (
        _round_up(nW, 8) * _round_up(feat, 128) * itemsize <= (128 << 10))

    kernel = functools.partial(
        _window_partition_kernel,
        kH=kH, kW=kW, sH=sH, sW=sW, nH=nH, nW=nW, nH2=nH2, nW2=nW2, C=C,
        full_tile=full_tile)

    # Input specs: current window-row (kH rows) + sH-row halo from the next window-row.
    row_spec = pl.BlockSpec(
        (pl.Squeezed(), pl.Squeezed(), kH, nW, kWC),
        lambda b, wi: (b, wi, 0, 0, 0))
    halo_spec = pl.BlockSpec(
        (pl.Squeezed(), pl.Squeezed(), sH, nW, kWC),
        lambda b, wi: (b, jnp.minimum(wi + 1, nH - 1), 0, 0, 0))
    # Output: per-batch block, resident across the window-row ("arbitrary") axis.
    out_spec = pl.BlockSpec(
        (pl.Squeezed(), n_total, feat),
        lambda b, wi: (b, 0, 0))

    # VMEM estimate: double-buffered row + halo inputs, (double-buffered) resident output.
    sub = _round_up(nW, 8)
    lane = _round_up(kWC, 128)
    in_blk = (kH + sH) * sub * lane * itemsize
    out_blk = _round_up(n_total, 8) * _round_up(feat, 128) * itemsize
    vmem_est = 2 * (in_blk + out_blk)
    compiler_kwargs = {}
    if vmem_est > (16 << 20):
        compiler_kwargs["vmem_limit_bytes"] = int(min(vmem_est + (2 << 20),
                                                      _vmem_cap_bytes()))

    # Purely HBM-bound kernel: tell XLA how much data it moves so neighbours overlap.
    bytes_accessed = (B * nH * (kH + sH) * W * C + B * n_total * feat) * itemsize

    return pl.pallas_call(
        kernel,
        out_shape=jax.ShapeDtypeStruct((B, n_total, feat), x.dtype),
        grid=(B, nH),
        in_specs=[row_spec, halo_spec],
        out_specs=out_spec,
        compiler_params=pltpu.CompilerParams(
            dimension_semantics=("parallel", "arbitrary"), **compiler_kwargs),
        cost_estimate=pl.CostEstimate(flops=0, transcendentals=0,
                                      bytes_accessed=bytes_accessed),
    )(x5, x5)


def _window_partition_ref(x_nchw, window_size):
    """Pure-JAX reference mirroring the PyTorch module, for validation."""
    kH, kW = _pair(window_size)
    sH, sW = kH // 2, kW // 2
    B, C, H, W = x_nchw.shape

    def part(x):
        b, c, h, w = x.shape
        nh, nw = h // kH, w // kW
        y = x.reshape(b, c, nh, kH, nw, kW)
        y = jnp.transpose(y, (0, 2, 4, 3, 5, 1))      # (B, nH, nW, kH, kW, C)
        return y.reshape(b, nh * nw, kH * kW * c)

    w1 = part(x_nchw)
    w2 = part(x_nchw[:, :, sH:H - sH, sW:W - sW])
    return jnp.concatenate([w1, w2], axis=1)


if __name__ == "__main__":
    key = jax.random.PRNGKey(0)
    B, C, H, W = 2, 4, 16, 16
    x = jax.random.normal(key, (B, C, H, W), dtype=jnp.float32)

    # Square and rectangular windows, NCHW (PyTorch-style) input.
    for ws in (4, (2, 4)):
        out = jax.block_until_ready(window_partition(x, ws))
        ref = _window_partition_ref(x, ws)
        np.testing.assert_allclose(np.asarray(out), np.asarray(ref), rtol=0, atol=0)

    # channels_last path (skips the NCHW->NHWC relayout) gives identical results.
    x_nhwc = jnp.transpose(x, (0, 2, 3, 1))
    out_cl = jax.block_until_ready(window_partition(x_nhwc, 4, channels_last=True))
    np.testing.assert_allclose(np.asarray(out_cl),
                               np.asarray(_window_partition_ref(x, 4)),
                               rtol=0, atol=0)

    print("KERNEL_OK")
</pallas_src>

<mosaic_0001>
module attributes {stable_mosaic.version = 11 : i64} {
  func.func @_window_partition_kernel(%arg0: i32, %arg1: i32, %arg2: memref<1x1x4x4x16xf32, #tpu.memory_space<vmem>>, %arg3: memref<1x1x2x4x16xf32, #tpu.memory_space<vmem>>, %arg4: memref<1x25x64xf32, #tpu.memory_space<vmem>>) attributes {dimension_semantics = [#tpu.dimension_semantics<parallel>, #tpu.dimension_semantics<arbitrary>], iteration_bounds = array<i64: 2, 4>, scalar_prefetch = 0 : i64, scratch_operands = 0 : i64, tpu.core_type = #tpu.core_type<tc>, window_params = [{transform_indices = @transform_0, window_bounds = array<i64: 1, 1, 4, 4, 16>}, {transform_indices = @transform_1, window_bounds = array<i64: 1, 1, 2, 4, 16>}, {transform_indices = @transform_2, window_bounds = array<i64: 1, 25, 64>}]} {
    %c4_i32 = arith.constant 4 : i32
    %0 = arith.muli %arg1, %c4_i32 : i32
    %1 = tpu.assume_multiple %0, 4 : i32
    %c0 = arith.constant 0 : index
    %c0_0 = arith.constant 0 : index
    %c0_1 = arith.constant 0 : index
    %c0_2 = arith.constant 0 : index
    %c0_3 = arith.constant 0 : index
    %2 = vector.load %arg2[%c0, %c0_0, %c0_1, %c0_2, %c0_3] : memref<1x1x4x4x16xf32, #tpu.memory_space<vmem>>, vector<1x1x1x4x16xf32>
    %3 = vector.shape_cast %2 : vector<1x1x1x4x16xf32> to vector<4x16xf32>
    %c0_4 = arith.constant 0 : index
    %c0_5 = arith.constant 0 : index
    %c1 = arith.constant 1 : index
    %c0_6 = arith.constant 0 : index
    %c0_7 = arith.constant 0 : index
    %4 = vector.load %arg2[%c0_4, %c0_5, %c1, %c0_6, %c0_7] : memref<1x1x4x4x16xf32, #tpu.memory_space<vmem>>, vector<1x1x1x4x16xf32>
    %5 = vector.shape_cast %4 : vector<1x1x1x4x16xf32> to vector<4x16xf32>
    %c0_8 = arith.constant 0 : index
    %c0_9 = arith.constant 0 : index
    %c2 = arith.constant 2 : index
    %c0_10 = arith.constant 0 : index
    %c0_11 = arith.constant 0 : index
    %6 = vector.load %arg2[%c0_8, %c0_9, %c2, %c0_10, %c0_11] : memref<1x1x4x4x16xf32, #tpu.memory_space<vmem>>, vector<1x1x1x4x16xf32>
    %7 = vector.shape_cast %6 : vector<1x1x1x4x16xf32> to vector<4x16xf32>
    %c0_12 = arith.constant 0 : index
    %c0_13 = arith.constant 0 : index
    %c3 = arith.constant 3 : index
    %c0_14 = arith.constant 0 : index
    %c0_15 = arith.constant 0 : index
    %8 = vector.load %arg2[%c0_12, %c0_13, %c3, %c0_14, %c0_15] : memref<1x1x4x4x16xf32, #tpu.memory_space<vmem>>, vector<1x1x1x4x16xf32>
    %9 = vector.shape_cast %8 : vector<1x1x1x4x16xf32> to vector<4x16xf32>
    %10 = tpu.concatenate %3, %5, %7, %9 in 1 : vector<4x16xf32>, vector<4x16xf32>, vector<4x16xf32>, vector<4x16xf32> -> vector<4x64xf32>
    %c0_16 = arith.constant 0 : index
    %11 = arith.index_cast %1 : i32 to index
    %c0_17 = arith.constant 0 : index
    %12 = vector.load %arg4[%c0_16, %11, %c0_17] : memref<1x25x64xf32, #tpu.memory_space<vmem>>, vector<1x4x64xf32>
    %13 = vector.shape_cast %12 : vector<1x4x64xf32> to vector<4x64xf32>
    %14 = vector.shape_cast %10 : vector<4x64xf32> to vector<1x4x64xf32>
    tpu.vector_store %arg4[%c0_16, %11, %c0_17], %14 {strides = array<i32>} : memref<1x25x64xf32, #tpu.memory_space<vmem>>, vector<1x4x64xf32>,
    %c3_i32 = arith.constant 3 : i32
    %15 = arith.cmpi slt, %arg1, %c3_i32 : i32
    %16 = arith.extui %15 : i1 to i32
    %c0_i32 = arith.constant 0 : i32
    %17 = arith.cmpi ne, %16, %c0_i32 : i32
    scf.if %17 {
      %c3_i32_18 = arith.constant 3 : i32
      %18 = arith.muli %arg1, %c3_i32_18 : i32
      %c16_i32 = arith.constant 16 : i32
      %19 = arith.addi %c16_i32, %18 : i32
      %c0_19 = arith.constant 0 : index
      %c0_20 = arith.constant 0 : index
      %c2_21 = arith.constant 2 : index
      %c0_22 = arith.constant 0 : index
      %c0_23 = arith.constant 0 : index
      %20 = vector.load %arg2[%c0_19, %c0_20, %c2_21, %c0_22, %c0_23] : memref<1x1x4x4x16xf32, #tpu.memory_space<vmem>>, vector<1x1x1x4x16xf32>
      %21 = vector.shape_cast %20 : vector<1x1x1x4x16xf32> to vector<4x16xf32>
      %22 = vector.extract_strided_slice %21 {offsets = [0, 8], sizes = [3, 8], strides = [1, 1]} : vector<4x16xf32> to vector<3x8xf32>
      %23 = vector.extract_strided_slice %21 {offsets = [1, 0], sizes = [3, 8], strides = [1, 1]} : vector<4x16xf32> to vector<3x8xf32>
      %24 = tpu.concatenate %22, %23 in 1 : vector<3x8xf32>, vector<3x8xf32> -> vector<3x16xf32>
      %c0_24 = arith.constant 0 : index
      %c0_25 = arith.constant 0 : index
      %c3_26 = arith.constant 3 : index
      %c0_27 = arith.constant 0 : index
      %c0_28 = arith.constant 0 : index
      %25 = vector.load %arg2[%c0_24, %c0_25, %c3_26, %c0_27, %c0_28] : memref<1x1x4x4x16xf32, #tpu.memory_space<vmem>>, vector<1x1x1x4x16xf32>
      %26 = vector.shape_cast %25 : vector<1x1x1x4x16xf32> to vector<4x16xf32>
      %27 = vector.extract_strided_slice %26 {offsets = [0, 8], sizes = [3, 8], strides = [1, 1]} : vector<4x16xf32> to vector<3x8xf32>
      %28 = vector.extract_strided_slice %26 {offsets = [1, 0], sizes = [3, 8], strides = [1, 1]} : vector<4x16xf32> to vector<3x8xf32>
      %29 = tpu.concatenate %27, %28 in 1 : vector<3x8xf32>, vector<3x8xf32> -> vector<3x16xf32>
      %c0_29 = arith.constant 0 : index
      %c0_30 = arith.constant 0 : index
      %c0_31 = arith.constant 0 : index
      %c0_32 = arith.constant 0 : index
      %c0_33 = arith.constant 0 : index
      %30 = vector.load %arg3[%c0_29, %c0_30, %c0_31, %c0_32, %c0_33] : memref<1x1x2x4x16xf32, #tpu.memory_space<vmem>>, vector<1x1x1x4x16xf32>
      %31 = vector.shape_cast %30 : vector<1x1x1x4x16xf32> to vector<4x16xf32>
      %32 = vector.extract_strided_slice %31 {offsets = [0, 8], sizes = [3, 8], strides = [1, 1]} : vector<4x16xf32> to vector<3x8xf32>
      %33 = vector.extract_strided_slice %31 {offsets = [1, 0], sizes = [3, 8], strides = [1, 1]} : vector<4x16xf32> to vector<3x8xf32>
      %34 = tpu.concatenate %32, %33 in 1 : vector<3x8xf32>, vector<3x8xf32> -> vector<3x16xf32>
      %c0_34 = arith.constant 0 : index
      %c0_35 = arith.constant 0 : index
      %c1_36 = arith.constant 1 : index
      %c0_37 = arith.constant 0 : index
      %c0_38 = arith.constant 0 : index
      %35 = vector.load %arg3[%c0_34, %c0_35, %c1_36, %c0_37, %c0_38] : memref<1x1x2x4x16xf32, #tpu.memory_space<vmem>>, vector<1x1x1x4x16xf32>
      %36 = vector.shape_cast %35 : vector<1x1x1x4x16xf32> to vector<4x16xf32>
      %37 = vector.extract_strided_slice %36 {offsets = [0, 8], sizes = [3, 8], strides = [1, 1]} : vector<4x16xf32> to vector<3x8xf32>
      %38 = vector.extract_strided_slice %36 {offsets = [1, 0], sizes = [3, 8], strides = [1, 1]} : vector<4x16xf32> to vector<3x8xf32>
      %39 = tpu.concatenate %37, %38 in 1 : vector<3x8xf32>, vector<3x8xf32> -> vector<3x16xf32>
      %40 = tpu.concatenate %24, %29, %34, %39 in 1 : vector<3x16xf32>, vector<3x16xf32>, vector<3x16xf32>, vector<3x16xf32> -> vector<3x64xf32>
      %c0_39 = arith.constant 0 : index
      %41 = arith.index_cast %19 : i32 to index
      %c0_40 = arith.constant 0 : index
      %42 = vector.load %arg4[%c0_39, %41, %c0_40] : memref<1x25x64xf32, #tpu.memory_space<vmem>>, vector<1x3x64xf32>
      %43 = vector.shape_cast %42 : vector<1x3x64xf32> to vector<3x64xf32>
      %44 = vector.shape_cast %40 : vector<3x64xf32> to vector<1x3x64xf32>
      tpu.vector_store %arg4[%c0_39, %41, %c0_40], %44 {strides = array<i32>} : memref<1x25x64xf32, #tpu.memory_space<vmem>>, vector<1x3x64xf32>,
    } else {
    }
    return
  }
  func.func @transform_0(%arg0: i32, %arg1: i32) -> (i32, i32, i32, i32, i32) {
    %c0_i32 = arith.constant 0 : i32
    %c0_i32_0 = arith.constant 0 : i32
    %c0_i32_1 = arith.constant 0 : i32
    %c0_i32_2 = arith.constant 0 : i32
    return %arg0, %arg1, %c0_i32, %c0_i32_0, %c0_i32_1 : i32, i32, i32, i32, i32
  }
  func.func @transform_1(%arg0: i32, %arg1: i32) -> (i32, i32, i32, i32, i32) {
    %c1_i32 = arith.constant 1 : i32
    %0 = arith.addi %arg1, %c1_i32 : i32
    %c3_i32 = arith.constant 3 : i32
    %1 = arith.minsi %0, %c3_i32 : i32
    %c0_i32 = arith.constant 0 : i32
    %c0_i32_0 = arith.constant 0 : i32
    %c0_i32_1 = arith.constant 0 : i32
    %c0_i32_2 = arith.constant 0 : i32
    return %arg0, %1, %c0_i32, %c0_i32_0, %c0_i32_1 : i32, i32, i32, i32, i32
  }
  func.func @transform_2(%arg0: i32, %arg1: i32) -> (i32, i32, i32) {
    %c0_i32 = arith.constant 0 : i32
    %c0_i32_0 = arith.constant 0 : i32
    %c0_i32_1 = arith.constant 0 : i32
    return %arg0, %c0_i32, %c0_i32_0 : i32, i32, i32
  }
}

</mosaic_0001>

<bundles_post_ra>
// kernel: window_partition.1
= control target key start
LH: loop header
LB: loop body
LE: loop exit
PB: predicated region body
PF: predicated region fallthrough
CT: control target
= control target key end

     0   :  { %s560_s9 = smov 0   ;;  %s562_s10 = smov 0   ;;  %s644_s0 = inlined_call_operand.vmem [shape: f32[2,4,4,4,16], index: 0, kind: input, shape index: {}, may-alias: {0,1}]   ;;  %s645_s1 = inlined_call_operand.vmem [shape: f32[2,4,4,4,16], index: 1, kind: input, shape index: {}, may-alias: {0,1}]   ;;  %s646_s2 = inlined_call_operand.vmem [shape: f32[2,25,64], index: 2, kind: output, shape index: {}]  }
   0x1   :  { %s564_s11 = smov 0   ;;  %s566_s12 = smov 0  }
   0x2   :  { %s568_s13 = smov 0  }
   0x3 LB: > { %s21_s14 = sadd.s32 1, %s527_s11  ;;  %s24_s15 = sadd.s32 1, %s531_s12  ;;  %s535_s13 = sphi %s568_s13, %s12_s13   ;;  %s531_s12 = sphi %s566_s12, %s650_s12   ;;  %s527_s11 = sphi %s564_s11, %s649_s11   ;;  %s523_s10 = sphi %s562_s10, %s648_s10   ;;  %s519_s9 = sphi %s560_s9, %s647_s9  }
   0x4   : > { %p22_p0 = scmp.ge.s32.totalorder %s21_s14, 4  ;;  %p425_p1 = scmp.ge.s32.totalorder %s535_s13, 1 }
   0x5   : > { %p158_p2 = scmp.lt.s32.totalorder %s535_s13, 9 }
   0x6   : > { %s652_s14 = smov (%p22_p0, %s21_s14), 0  ;;  %s654_s15 = smov (!%p22_p0, %s24_s15), %s531_s12 }
   0x7   : > { %p159_p3 = pnand %p425_p1, %p158_p2  ;;  %p26_p4 = scmp.ge.s32.totalorder %s654_s15, 2 }
   0x8   : > { %p196_p5 = scmp.lt.s32.totalorder (!%p159_p3), %s523_s10, 1  ;;  %p198_p6 = scmp.lt.s32.totalorder (!%p159_p3), %s519_s9, 3  ;;  %vm245_vm0 = vcmask (!%p159_p3), 130048   ;;  %vm247_vm1 = vcmask (!%p159_p3), 261120   ;;  %vm249_vm2 = vcmask (!%p159_p3), 392192   ;;  %vm252_vm3 = vcmask (!%p159_p3), 519168  }
   0x9   : > { %s656_s15 = smov (%p26_p4, %s654_s15), 0  ;;  %162 = sbr.rel (%p159_p3) target bundleno = 273 (0x111), region = 28 }
   0xa   : > { %s205_s16 = sadd.s32 (!%p159_p3), 1, %s519_s9  ;;  %s537_s25 = smov (!%p159_p3), 16  }
   0xb   : > { %p206_p7 = scmp.lt.s32.totalorder (!%p159_p3), %s205_s16, 3  ;;  %s538_s26 = smov (!%p159_p3), 48  }
   0xc   : > { %s539_s29 = smov (!%p159_p3), 32   ;;  %p441_p8 = scmp.ge.s32.totalorder (!%p159_p3), %s519_s9, 3 }
  0x10   : > { %s658_s10 = smov (!%p196_p5, %s523_s10), 1  ;;  %s660_s16 = smov (!%p206_p7, %s205_s16), 3 }
  0x11   : > { %s199_s17 = scalar_select %p198_p6, %s519_s9, 3 }
  0x12   : > { %s427_s18 = sshll.u32 %s658_s10, 4  ;;  %s662_s16 = smov (!%p206_p7, %s660_s16), 3  ;;  %vm269_vm4 = vcmask (!%p441_p8), 64512   ;;  %vm318_vm5 = vcmask (!%p441_p8), 518144  }
  0x13   : > { %s426_s19 = sshll.u32 %s199_s17, 2  ;;  %s432_s27 = sshll.u32 %s662_s16, 2 }
  0x14   : > { %s202_s20 = sadd.s32 %s427_s18, %s426_s19  ;;  %s214_s28 = sadd.s32 %s432_s27, %s427_s18 }
  0x15   : > { %s428_s21 = sshll.u32 %s202_s20, 2  ;;  %s434_s30 = sshll.u32 %s214_s28, 2 }
  0x16   : > { %s598_s24 = scalar_lea.vmem %s644_s0, %s428_s21  ;;  %s216_s5 = scalar_lea.vmem %s645_s1, %s434_s30 }
  0x17   : > { %v438_v0 = vld [vmem:[%s598_s24 + $0x4] sm:$0xf]  ;;  %v440_v1 = vld [vmem:[%s598_s24 + $0xc] sm:$0xf]  ;;  %v439_v2 = vld [vmem:[%s598_s24 + $0x8] sm:$0xf] }
  0x18   : > { %234 = vrot.lane.b32.xlu0 %v438_v0, %s537_s25  ;;  %242 = vrot.lane.b32.xlu1 %v440_v1, %s538_s26  ;;  %s448_s6 = sshll.u32 %s658_s10, 5  ;;  %v226_v4 = vld [vmem:[%s598_s24] sm:$0xf]  ;;  %s437_s19 = sshll.u32 %s519_s9, 2  ;;  %v443_v11 = vld [vmem:[%s598_s24 + $0xc] sm:$0xf] (!%p441_p8) }
  0x19   : > { %s610_s17 = scalar_lea.vmem %s646_s2, %s448_s6  ;;  %v281_v10 = vld [vmem:[%s216_s5] sm:$0xf] (!%p441_p8)  ;;  %s540_s10 = smov (!%p441_p8), 120   ;;  %v276_v13 = vrot.slane (!%p441_p8), %v443_v11, 1  ;;  %v444_v14 = vld [vmem:[%s216_s5 + $0x4] sm:$0xf] (!%p441_p8) }
  0x1a   : > { %s251_s16 = scalar_lea.vmem %s610_s17, %s437_s19  ;;  %v286_v12 = vrot.slane (!%p441_p8), %v281_v10, 1  ;;  %s541_s18 = smov (!%p441_p8), 8   ;;  %v297_v15 = vrot.slane (!%p441_p8), %v444_v14, 1  ;;  %v442_v16 = vld [vmem:[%s598_s24 + $0x8] sm:$0xf] (!%p441_p8) }
  0x1b   : > { %v265_v17 = vrot.slane (!%p441_p8), %v442_v16, 1  ;;  %s542_s20 = smov (!%p441_p8), 16   ;;  %s543_s21 = smov (!%p441_p8), 32  }
  0x1c   : > { %238 = vrot.lane.b32.xlu0 %v439_v2, %s539_s29  ;;  %283 = vrot.lane.b32.xlu1 (!%p441_p8), %v281_v10, %s540_s10  ;;  %s544_s22 = smov (!%p441_p8), 48   ;;  %s377_s23 = smul.u32 (!%p441_p8), 3, %s519_s9 }
  0x1e   : > { %s378_s24 = scalar_lea.vmem (!%p441_p8), %s610_s17, %s377_s23 }
  0x20   : > { %273 = vrot.lane.b32.xlu0 (!%p441_p8), %v443_v11, %s540_s10  ;;  %287 = vrot.lane.b32.xlu1 (!%p441_p8), %v286_v12, %s541_s18 }
  0x24   : > { %277 = vrot.lane.b32.xlu0 (!%p441_p8), %v276_v13, %s541_s18  ;;  %298 = vrot.lane.b32.xlu1 (!%p441_p8), %v297_v15, %s541_s18 }
  0x28   : > { %294 = vrot.lane.b32.xlu0 (!%p441_p8), %v444_v14, %s540_s10  ;;  %266 = vrot.lane.b32.xlu1 (!%p441_p8), %v265_v17, %s541_s18 }
  0x2c   : > { %262 = vrot.lane.b32.xlu0 (!%p441_p8), %v442_v16, %s540_s10 }
  0x8a   : > { %v235_v3 = vpop.permute.xlu0 %234  ;;  %v243_v5 = vpop.permute.xlu1 %242 }
  0x8b   : > { %v246_v6 = vsel %vm245_vm0, %v226_v4, %v235_v3  ;;  %257 = sbr.rel (%p441_p8) target bundleno = 273 (0x111), region = 32 }
  0x8e   : > { %v239_v7 = vpop.permute.xlu0 %238  ;;  %v284_v18 = vpop.permute.xlu1 (!%p441_p8), %283 }
  0x8f   : > { %v248_v8 = vsel %vm247_vm1, %v246_v6, %v239_v7 }
  0x90   : > { %v250_v9 = vsel %vm249_vm2, %v248_v8, %v243_v5 }
  0x91   : > { %253 = vst.msk [vmem:[%s251_s16] sm:$0xf] %vm252_vm3, %v250_v9 }
  0x92   : > { %v274_v19 = vpop.permute.xlu0 %273  ;;  %v288_v20 = vpop.permute.xlu1 %287 }
  0x93   : > { %v290_v23 = vsel %vm269_vm4, %v284_v18, %v288_v20 }
  0x94   : > { %307 = vrot.lane.b32.xlu1 %v290_v23, %s543_s21 }
  0x96   : > { %v278_v21 = vpop.permute.xlu0 %277  ;;  %v299_v24 = vpop.permute.xlu1 %298 }
  0x97   : > { %v280_v22 = vsel %vm269_vm4, %v274_v19, %v278_v21 }
  0x98   : > { %303 = vrot.lane.b32.xlu0 %v280_v22, %s542_s20 }
  0x9a   : > { %v295_v25 = vpop.permute.xlu0 %294  ;;  %v267_v28 = vpop.permute.xlu1 %266 }
  0x9b   : > { %v301_v26 = vsel %vm269_vm4, %v295_v25, %v299_v24 }
  0x9c   : > { %311 = vrot.lane.b32.xlu0 %v301_v26, %s544_s22 }
  0x9e   : > { %v263_v27 = vpop.permute.xlu0 %262 }
  0x9f   : > { %v270_v30 = vsel %vm269_vm4, %v263_v27, %v267_v28 }
 0x106   : > { %v308_v32 = vpop.permute.xlu1 %307 }
 0x10a   : > { %v304_v29 = vpop.permute.xlu0 %303 }
 0x10b   : > { %v314_v31 = vsel %vm245_vm0, %v270_v30, %v304_v29 }
 0x10c   : > { %v315_v33 = vsel %vm247_vm1, %v314_v31, %v308_v32 }
 0x10e   : > { %v312_v34 = vpop.permute.xlu0 %311 }
 0x10f   : > { %v316_v35 = vsel %vm249_vm2, %v315_v33, %v312_v34 }
 0x110   : > { %445 = vst.msk [vmem:[%s378_s24 + $0x10] sm:$0x7] %vm318_vm5, %v316_v35 }
 0x111 PF: > { %s12_s13 = sadd.s32 1, %s535_s13   ;;  %s647_s9 = smov %s527_s11 }
 0x112   : > { %p9_p9 = scmp.ge.s32.totalorder %s12_s13, 10   ;;  %s648_s10 = smov %s531_s12 }
 0x113   : > { %s649_s11 = smov %s652_s14  ;;  %s650_s12 = smov %s656_s15 }
 0x114   :  { %11 = sbr.rel (!%p9_p9) target bundleno = 3 (0x3), region = 71 }

</bundles_post_ra>
